<compile_context>
chip_gen: v6e
topology: v6e:2x2x1
jax: 0.10.0
libtpu: 0.0.40
codegen_flags: <defaults>
</compile_context>

<pallas_src>
import jax
import jax.numpy as jnp
import numpy as np
from jax.experimental import pallas as pl
from jax.experimental.pallas import tpu as pltpu


def attention_head_kernel(x1_ref, x2_ref, w1_ref, b1_ref, w2_ref, b2_ref,
                          wr_ref, br_ref, o_ref):
    # x1/x2: (BB, S, H) blocks of the last / second-to-last hidden states.
    BB, S, H = x1_ref.shape

    # mean of the last two hidden states
    x = (x1_ref[...] + x2_ref[...]) * jnp.float32(0.5)                 # (BB, S, H)

    # ---- attention MLP: Linear(H -> 512) + Tanh --------------------------------
    # Flatten batch*seq into the MXU M dimension: one big matmul.
    xm = x.reshape(BB * S, H)                                           # (BB*S, H)
    a = jnp.tanh(
        jnp.dot(xm, w1_ref[...], preferred_element_type=jnp.float32)
        + b1_ref[...])                                                  # (BB*S, 512)

    # ---- Linear(512 -> 1): VPU multiply + lane reduce (avoid N=1 matmul) -------
    s_col = jnp.sum(a * w2_ref[...], axis=-1, keepdims=True) + b2_ref[...]  # (BB*S, 1)
    scores = s_col.reshape(BB, S, 1)                                    # (BB, S, 1)

    # ---- softmax over the sequence axis (dim=1) --------------------------------
    m = jnp.max(scores, axis=1, keepdims=True)
    e = jnp.exp(scores - m)
    wts = e / jnp.sum(e, axis=1, keepdims=True)                         # (BB, S, 1)

    # ---- context vector: weighted sum over the sequence ------------------------
    ctx = jnp.sum(wts * x, axis=1)                                      # (BB, H)

    # ---- regressor Linear(H -> 1): VPU multiply + lane reduce -------------------
    out = jnp.sum(ctx * wr_ref[...], axis=-1, keepdims=True) + br_ref[...]  # (BB, 1)

    # output block is (1, BB, 1): leading unit dim keeps the minor layout unchanged
    o_ref[...] = out[None, :, :].astype(o_ref.dtype)


def attention_model_l2_head(hs_last, hs_prev, w_att1, b_att1, w_att2, b_att2,
                            w_reg, b_reg, *, block_b=None):
    B, S, H = hs_last.shape
    C = w_att1.shape[-1]
    if block_b is None:
        block_b = min(B, 8)
    assert B % block_b == 0, "batch must be divisible by block_b"
    num_blocks = B // block_b

    x_spec = pl.BlockSpec((block_b, S, H), lambda i: (i, 0, 0))

    out3 = pl.pallas_call(
        attention_head_kernel,
        out_shape=jax.ShapeDtypeStruct((num_blocks, block_b, 1), jnp.float32),
        grid_spec=pltpu.PrefetchScalarGridSpec(
            num_scalar_prefetch=0,
            grid=(num_blocks,),
            in_specs=[
                x_spec,                                       # hs_last block
                x_spec,                                       # hs_prev block
                pl.BlockSpec((H, C), lambda i: (0, 0)),       # w_att1 (H, 512)
                pl.BlockSpec((1, C), lambda i: (0, 0)),       # b_att1 (1, 512)
                pl.BlockSpec((1, C), lambda i: (0, 0)),       # w_att2 row (1, 512)
                pl.BlockSpec((1, 1), lambda i: (0, 0)),       # b_att2 (1, 1)
                pl.BlockSpec((1, H), lambda i: (0, 0)),       # w_reg row (1, H)
                pl.BlockSpec((1, 1), lambda i: (0, 0)),       # b_reg (1, 1)
            ],
            out_specs=pl.BlockSpec((1, block_b, 1), lambda i: (i, 0, 0)),
        ),
        compiler_params=pltpu.CompilerParams(
            dimension_semantics=("parallel",),
            vmem_limit_bytes=32 * 1024 * 1024,
        ),
    )(hs_last, hs_prev, w_att1, b_att1, w_att2, b_att2, w_reg, b_reg)

    return out3.reshape(B, 1)


def reference(hs_last, hs_prev, w_att1, b_att1, w_att2, b_att2, w_reg, b_reg):
    # Pure-JAX reference of the same attention-pooling head.
    x = (hs_last + hs_prev) * 0.5                                        # (B, S, H)
    a = jnp.tanh(jnp.einsum('bsh,hc->bsc', x, w_att1) + b_att1[None, :, :])
    scores = jnp.einsum('bsc,c->bs', a, w_att2[0]) + b_att2[0, 0]        # (B, S)
    wts = jax.nn.softmax(scores, axis=1)[..., None]                      # (B, S, 1)
    ctx = jnp.sum(wts * x, axis=1)                                       # (B, H)
    return ctx @ w_reg[0][:, None] + b_reg[0, 0]                         # (B, 1)


if __name__ == "__main__":
    # Small shapes consistent with the forward: B=4 sequences, S=8 tokens,
    # hidden H=128 (stand-in for roberta hidden_size), attention width C=512.
    B, S, H, C = 4, 8, 128, 512

    key = jax.random.PRNGKey(0)
    k = jax.random.split(key, 8)

    hs_last = jax.random.normal(k[0], (B, S, H), jnp.float32)
    hs_prev = jax.random.normal(k[1], (B, S, H), jnp.float32)

    # Linear weights stored transposed (in_features, out_features) relative to
    # torch; the out_features=1 linears are stored as lane-dense (1, in) rows.
    b1s = 1.0 / np.sqrt(H)
    w_att1 = jax.random.uniform(k[2], (H, C), jnp.float32, -b1s, b1s)
    b_att1 = jax.random.uniform(k[3], (1, C), jnp.float32, -b1s, b1s)
    b2s = 1.0 / np.sqrt(C)
    w_att2 = jax.random.uniform(k[4], (1, C), jnp.float32, -b2s, b2s)
    b_att2 = jax.random.uniform(k[5], (1, 1), jnp.float32, -b2s, b2s)
    brs = 1.0 / np.sqrt(H)
    w_reg = jax.random.uniform(k[6], (1, H), jnp.float32, -brs, brs)
    b_reg = jax.random.uniform(k[7], (1, 1), jnp.float32, -brs, brs)

    out = attention_model_l2_head(hs_last, hs_prev, w_att1, b_att1, w_att2,
                                  b_att2, w_reg, b_reg, block_b=2)
    out = jax.block_until_ready(out)

    ref = jax.block_until_ready(reference(hs_last, hs_prev, w_att1, b_att1,
                                          w_att2, b_att2, w_reg, b_reg))
    np.testing.assert_allclose(np.asarray(out), np.asarray(ref),
                               rtol=1e-2, atol=1e-2)
    assert out.shape == (B, 1)

    print("KERNEL_OK")
</pallas_src>

<mosaic_0001>
module attributes {stable_mosaic.version = 11 : i64} {
  func.func @attention_head_kernel(%arg0: i32, %arg1: memref<2x8x128xf32, #tpu.memory_space<vmem>>, %arg2: memref<2x8x128xf32, #tpu.memory_space<vmem>>, %arg3: memref<128x512xf32, #tpu.memory_space<vmem>>, %arg4: memref<1x512xf32, #tpu.memory_space<vmem>>, %arg5: memref<1x512xf32, #tpu.memory_space<vmem>>, %arg6: memref<1x1xf32, #tpu.memory_space<vmem>>, %arg7: memref<1x128xf32, #tpu.memory_space<vmem>>, %arg8: memref<1x1xf32, #tpu.memory_space<vmem>>, %arg9: memref<1x2x1xf32, #tpu.memory_space<vmem>>) attributes {dimension_semantics = [#tpu.dimension_semantics<parallel>], iteration_bounds = array<i64: 2>, scalar_prefetch = 0 : i64, scratch_operands = 0 : i64, tpu.core_type = #tpu.core_type<tc>, window_params = [{transform_indices = @transform_0, window_bounds = array<i64: 2, 8, 128>}, {transform_indices = @transform_1, window_bounds = array<i64: 2, 8, 128>}, {pipeline_mode = #tpu.pipeline_mode<synchronous>, transform_indices = @transform_2, window_bounds = array<i64: 128, 512>}, {pipeline_mode = #tpu.pipeline_mode<synchronous>, transform_indices = @transform_3, window_bounds = array<i64: 1, 512>}, {pipeline_mode = #tpu.pipeline_mode<synchronous>, transform_indices = @transform_4, window_bounds = array<i64: 1, 512>}, {pipeline_mode = #tpu.pipeline_mode<synchronous>, transform_indices = @transform_5, window_bounds = array<i64: 1, 1>}, {pipeline_mode = #tpu.pipeline_mode<synchronous>, transform_indices = @transform_6, window_bounds = array<i64: 1, 128>}, {pipeline_mode = #tpu.pipeline_mode<synchronous>, transform_indices = @transform_7, window_bounds = array<i64: 1, 1>}, {transform_indices = @transform_8, window_bounds = array<i64: 1, 2, 1>}]} {
    %c0 = arith.constant 0 : index
    %c0_0 = arith.constant 0 : index
    %c0_1 = arith.constant 0 : index
    %0 = vector.load %arg1[%c0, %c0_0, %c0_1] : memref<2x8x128xf32, #tpu.memory_space<vmem>>, vector<2x8x128xf32>
    %c0_2 = arith.constant 0 : index
    %c0_3 = arith.constant 0 : index
    %c0_4 = arith.constant 0 : index
    %1 = vector.load %arg2[%c0_2, %c0_3, %c0_4] : memref<2x8x128xf32, #tpu.memory_space<vmem>>, vector<2x8x128xf32>
    %2 = arith.addf %0, %1 : vector<2x8x128xf32>
    %cst = arith.constant 5.000000e-01 : f32
    %3 = vector.broadcast %cst : f32 to vector<2x8x128xf32>
    %4 = arith.mulf %2, %3 : vector<2x8x128xf32>
    %5 = vector.shape_cast %4 : vector<2x8x128xf32> to vector<16x128xf32>
    %c0_5 = arith.constant 0 : index
    %c0_6 = arith.constant 0 : index
    %6 = vector.load %arg3[%c0_5, %c0_6] : memref<128x512xf32, #tpu.memory_space<vmem>>, vector<128x512xf32>
    %cst_7 = arith.constant dense<0.000000e+00> : vector<16x512xf32>
    %7 = tpu.matmul %5, %6, %cst_7 {dimension_numbers = #tpu.dot_dimension_numbers<[1], [0], [0], [1], [0, 0, 1, 1], [], []>} : vector<16x128xf32>, vector<128x512xf32>, vector<16x512xf32> -> vector<16x512xf32>
    %c0_8 = arith.constant 0 : index
    %c0_9 = arith.constant 0 : index
    %8 = vector.load %arg4[%c0_8, %c0_9] : memref<1x512xf32, #tpu.memory_space<vmem>>, vector<1x512xf32>
    %9 = vector.broadcast %8 : vector<1x512xf32> to vector<16x512xf32>
    %10 = arith.addf %7, %9 : vector<16x512xf32>
    %11 = math.tanh %10 : vector<16x512xf32>
    %c0_10 = arith.constant 0 : index
    %c0_11 = arith.constant 0 : index
    %12 = vector.load %arg5[%c0_10, %c0_11] : memref<1x512xf32, #tpu.memory_space<vmem>>, vector<1x512xf32>
    %13 = vector.broadcast %12 : vector<1x512xf32> to vector<16x512xf32>
    %14 = arith.mulf %11, %13 : vector<16x512xf32>
    %cst_12 = arith.constant dense<0.000000e+00> : vector<16xf32>
    %15 = vector.multi_reduction <add>, %14, %cst_12 [1] : vector<16x512xf32> to vector<16xf32>
    %16 = vector.shape_cast %15 : vector<16xf32> to vector<16x1xf32>
    %c0_13 = arith.constant 0 : index
    %c0_14 = arith.constant 0 : index
    %17 = vector.load %arg6[%c0_13, %c0_14] : memref<1x1xf32, #tpu.memory_space<vmem>>, vector<1x1xf32>
    %18 = vector.broadcast %17 : vector<1x1xf32> to vector<16x1xf32>
    %19 = arith.addf %16, %18 : vector<16x1xf32>
    %20 = vector.shape_cast %19 : vector<16x1xf32> to vector<2x8x1xf32>
    %cst_15 = arith.constant dense<0xFF800000> : vector<2x1xf32>
    %21 = vector.multi_reduction <maximumf>, %20, %cst_15 [1] : vector<2x8x1xf32> to vector<2x1xf32>
    %22 = vector.shape_cast %21 : vector<2x1xf32> to vector<2x1x1xf32>
    %23 = vector.broadcast %22 : vector<2x1x1xf32> to vector<2x8x1xf32>
    %24 = arith.subf %20, %23 : vector<2x8x1xf32>
    %25 = math.exp %24 : vector<2x8x1xf32>
    %cst_16 = arith.constant dense<0.000000e+00> : vector<2x1xf32>
    %26 = vector.multi_reduction <add>, %25, %cst_16 [1] : vector<2x8x1xf32> to vector<2x1xf32>
    %27 = vector.shape_cast %26 : vector<2x1xf32> to vector<2x1x1xf32>
    %28 = vector.broadcast %27 : vector<2x1x1xf32> to vector<2x8x1xf32>
    %29 = arith.divf %25, %28 : vector<2x8x1xf32>
    %30 = vector.broadcast %29 : vector<2x8x1xf32> to vector<2x8x128xf32>
    %31 = arith.mulf %30, %4 : vector<2x8x128xf32>
    %cst_17 = arith.constant dense<0.000000e+00> : vector<2x128xf32>
    %32 = vector.multi_reduction <add>, %31, %cst_17 [1] : vector<2x8x128xf32> to vector<2x128xf32>
    %c0_18 = arith.constant 0 : index
    %c0_19 = arith.constant 0 : index
    %33 = vector.load %arg7[%c0_18, %c0_19] : memref<1x128xf32, #tpu.memory_space<vmem>>, vector<1x128xf32>
    %34 = vector.broadcast %33 : vector<1x128xf32> to vector<2x128xf32>
    %35 = arith.mulf %32, %34 : vector<2x128xf32>
    %cst_20 = arith.constant dense<0.000000e+00> : vector<2xf32>
    %36 = vector.multi_reduction <add>, %35, %cst_20 [1] : vector<2x128xf32> to vector<2xf32>
    %37 = vector.shape_cast %36 : vector<2xf32> to vector<2x1xf32>
    %c0_21 = arith.constant 0 : index
    %c0_22 = arith.constant 0 : index
    %38 = vector.load %arg8[%c0_21, %c0_22] : memref<1x1xf32, #tpu.memory_space<vmem>>, vector<1x1xf32>
    %39 = vector.broadcast %38 : vector<1x1xf32> to vector<2x1xf32>
    %40 = arith.addf %37, %39 : vector<2x1xf32>
    %41 = vector.shape_cast %40 : vector<2x1xf32> to vector<1x2x1xf32>
    %c0_23 = arith.constant 0 : index
    %c0_24 = arith.constant 0 : index
    %c0_25 = arith.constant 0 : index
    %42 = vector.load %arg9[%c0_23, %c0_24, %c0_25] : memref<1x2x1xf32, #tpu.memory_space<vmem>>, vector<1x2x1xf32>
    tpu.vector_store %arg9[%c0_23, %c0_24, %c0_25], %41 {strides = array<i32>} : memref<1x2x1xf32, #tpu.memory_space<vmem>>, vector<1x2x1xf32>,
    return
  }
  func.func @transform_0(%arg0: i32) -> (i32, i32, i32) {
    %c0_i32 = arith.constant 0 : i32
    %c0_i32_0 = arith.constant 0 : i32
    %c0_i32_1 = arith.constant 0 : i32
    return %arg0, %c0_i32, %c0_i32_0 : i32, i32, i32
  }
  func.func @transform_1(%arg0: i32) -> (i32, i32, i32) {
    %c0_i32 = arith.constant 0 : i32
    %c0_i32_0 = arith.constant 0 : i32
    %c0_i32_1 = arith.constant 0 : i32
    return %arg0, %c0_i32, %c0_i32_0 : i32, i32, i32
  }
  func.func @transform_2(%arg0: i32) -> (i32, i32) {
    %c0_i32 = arith.constant 0 : i32
    %c0_i32_0 = arith.constant 0 : i32
    %c0_i32_1 = arith.constant 0 : i32
    return %c0_i32, %c0_i32_0 : i32, i32
  }
  func.func @transform_3(%arg0: i32) -> (i32, i32) {
    %c0_i32 = arith.constant 0 : i32
    %c0_i32_0 = arith.constant 0 : i32
    %c0_i32_1 = arith.constant 0 : i32
    return %c0_i32, %c0_i32_0 : i32, i32
  }
  func.func @transform_4(%arg0: i32) -> (i32, i32) {
    %c0_i32 = arith.constant 0 : i32
    %c0_i32_0 = arith.constant 0 : i32
    %c0_i32_1 = arith.constant 0 : i32
    return %c0_i32, %c0_i32_0 : i32, i32
  }
  func.func @transform_5(%arg0: i32) -> (i32, i32) {
    %c0_i32 = arith.constant 0 : i32
    %c0_i32_0 = arith.constant 0 : i32
    %c0_i32_1 = arith.constant 0 : i32
    return %c0_i32, %c0_i32_0 : i32, i32
  }
  func.func @transform_6(%arg0: i32) -> (i32, i32) {
    %c0_i32 = arith.constant 0 : i32
    %c0_i32_0 = arith.constant 0 : i32
    %c0_i32_1 = arith.constant 0 : i32
    return %c0_i32, %c0_i32_0 : i32, i32
  }
  func.func @transform_7(%arg0: i32) -> (i32, i32) {
    %c0_i32 = arith.constant 0 : i32
    %c0_i32_0 = arith.constant 0 : i32
    %c0_i32_1 = arith.constant 0 : i32
    return %c0_i32, %c0_i32_0 : i32, i32
  }
  func.func @transform_8(%arg0: i32) -> (i32, i32, i32) {
    %c0_i32 = arith.constant 0 : i32
    %c0_i32_0 = arith.constant 0 : i32
    %c0_i32_1 = arith.constant 0 : i32
    return %arg0, %c0_i32, %c0_i32_0 : i32, i32, i32
  }
}

</mosaic_0001>

<bundles_post_ra>
// kernel: tpu_custom_call.1
= control target key start
LH: loop header
LB: loop body
LE: loop exit
PB: predicated region body
PF: predicated region fallthrough
CT: control target
= control target key end

     0   :  { %s1393_s0 = inlined_call_operand.hbm [shape: f32[4,8,128], index: 0, kind: input, shape index: {}]   ;;  %s1394_s1 = inlined_call_operand.hbm [shape: f32[4,8,128], index: 1, kind: input, shape index: {}]   ;;  %s1395_s2 = inlined_call_operand.hbm [shape: f32[128,512], index: 2, kind: input, shape index: {}]   ;;  %s1396_s3 = inlined_call_operand.vmem [shape: f32[1,512], index: 3, kind: input, shape index: {}]   ;;  %s1397_s4 = inlined_call_operand.vmem [shape: f32[1,512], index: 4, kind: input, shape index: {}]   ;;  %s1398_s5 = inlined_call_operand.<no memory space> [shape: f32[1,1], index: 5, kind: input, shape index: {}]   ;;  %s1399_s6 = inlined_call_operand.vmem [shape: f32[1,128], index: 6, kind: input, shape index: {}]   ;;  %s1400_s8 = inlined_call_operand.vmem [shape: f32[2,2,1], index: 8, kind: output, shape index: {}]   ;;  %s1401_s7 = inlined_call_operand.<no memory space> [shape: f32[1,1], index: 7, kind: input, shape index: {}]  }
   0x1   :  { %v13_v0 = vstv %s1398_s5  ;;  %v15_v1 = vstv %s1401_s7 }
   0x2   :  { %14 = vst [vmem:[#allocation2] sm:$0x1] %v13_v0  ;;  %16 = vst [vmem:[#allocation3] sm:$0x1] %v15_v1 }
   0x3   :  { %17 = vsyncpa [#allocation5], 0 }
   0x4   :  { %19 = vsyncpa [#allocation5 + $0x1], 0 }
   0x5   :  { %20 = vsyncpa [#allocation7], 0 }
   0x6   :  { %22 = vsyncpa [#allocation7 + $0x1], 0  ;;  %s1173_s9 = smov 0   ;;  %s1175_s10 = smov 0  }
   0x7   :  { %s1177_s11 = smov 0   ;;  %s1179_s12 = smov 0  }
   0x8 LB: > { %s1192_s5 = sadd.s32 4294967295, %s1111_s12   ;;  %p48_p0 = scmp.ne.s32.totalorder %s1103_s10, %s1099_s9  ;;  %s1111_s12 = sphi %s1179_s12, %s1414_s12   ;;  %s1107_s11 = sphi %s1177_s11, %s1413_s11   ;;  %s1103_s10 = sphi %s1175_s10, %s1412_s10   ;;  %s1099_s9 = sphi %s1173_s9, %s1411_s9  }
   0x9   : > { %p1402_p1 = scmp.eq.s32.totalorder %s1192_s5, 0  ;;  %p879_p2 = scmp.ge.s32.totalorder %s1111_s12, 1 }
   0xa   : > { %p237_p3 = scmp.lt.s32.totalorder %s1111_s12, 3  ;;  %s1113_s14 = smov [#allocation8]  }
   0xb   : > { %p1200_p4 = por %p1402_p1, %p48_p0  ;;  %s249_s15 = sshll.u32 %s1113_s14, 4  ;;  %s250_s15 = int_to_ptr.vmem [resolvable:$true] %s249_s15 }
   0xc   : > { %p1204_p5 = pnand %p879_p2, %p237_p3  ;;  %s1217_s17 = sadd.s32 1, %s1111_s12  }
   0xd   : > { %s1404_s7 = scalar_select %p1200_p4, 1, 0 }
   0xe   : > { %p908_p6 = pneg %p1204_p5  ;;  %s35_s18 = sadd.s32 1, %s1107_s11 }
   0xf   : > { %s32_s19 = ssub.s32 %s1111_s12, %s1217_s17  ;;  %s998_s20 = scalar_lea.vmem %s250_s15, 8192 }
  0x10   : > { %p1212_p7 = pnand %p908_p6, %p1402_p1  ;;  %p999_p9 = scmp.ne.s32.totalorder %s250_s15, %s998_s20 }
  0x11   : > { %p1006_p12 = scmp.lt.s32.totalorder %s250_s15, %s250_s15  ;;  %p1007_p13 = scmp.lt.s32.totalorder %s998_s20, %s998_s20 }
  0x12   : > { %p989_p8 = pneg %p1212_p7 }
  0x13   : > { %p1008_p0 = por %p1007_p13, %p1006_p12 }
  0x14   : > { %p1001_p10 = pnand %p999_p9, %p989_p8 }
  0x16   : > { %p1002_p11 = pneg %p1001_p10 }
  0x18   : > { %p1009_p2 = pnand %p1008_p0, %p1002_p11 }
  0x1a   : > { %1012 = shalt.err (!%p1009_p2)
}
  0x1b   : > { %s1114_s21 = smov 512   ;;  %s1115_s22 = smov 32  }
  0x1c   : > { %911 = dma.hbm_to_vmem [thread:$0]  (!%p1212_p7), %s1395_s2, 8192, %s250_s15, [#allocation7], %s1114_s21, %s1114_s21, %s1115_s22  }
  0x1d   : > { %p33_p3 = scmp.eq.s32.totalorder %s32_s19, 0  ;;  %p42_p6 = scmp.ne.s32.totalorder %s1107_s11, %s1103_s10 }
  0x1e   : > { %p43_p8 = scmp.eq.s32.totalorder %s1111_s12, 0  ;;  %p920_p9 = scmp.lt.s32.totalorder %s1111_s12, 2 }
  0x1f   : > { %s1234_s25 = scalar_select %p33_p3, %s1107_s11, %s35_s18  }
  0x20   : > { %p44_p10 = por %p43_p8, %p42_p6  ;;  %s278_s26 = sand.u32 1, %s1107_s11  }
  0x21   : > { %s1237_s27 = sshll.u32 %s278_s26, 4  ;;  %s898_s28 = sshll.u32 %s1111_s12, 8 }
  0x22   : > { %s1245_s9 = scalar_lea.hbm %s1393_s0, %s898_s28  ;;  %s282_s14 = scalar_lea.vmem [#allocation4], %s1237_s27 }
  0x23   : > { %s289_s15 = sshll.u32 %s282_s14, 4  ;;  %p1250_p7 = pnand %p920_p9, %p44_p10  ;;  %s1248_s15 = int_to_ptr.vmem [resolvable:$true] %s289_s15 }
  0x24   : > { %s1254_s18 = scalar_lea.sflag [#allocation5], %s278_s26  ;;  %s1013_s19 = scalar_lea.hbm %s1245_s9, 256 }
  0x25   : > { %p1014_p11 = scmp.ne.s32.totalorder %s1245_s9, %s1013_s19  ;;  %p1015_p12 = pneg %p1250_p7 }
  0x26   : > { %s1018_s22 = scalar_lea.hbm %s1393_s0, 512  ;;  %p1019_p2 = scmp.lt.s32.totalorder %s1245_s9, %s1393_s0 }
  0x27   : > { %p1016_p13 = pnand %p1015_p12, %p1014_p11  ;;  %p1020_p3 = scmp.lt.s32.totalorder %s1018_s22, %s1013_s19 }
  0x29   : > { %p1017_p0 = pneg %p1016_p13  ;;  %p1021_p6 = por %p1020_p3, %p1019_p2 }
  0x2b   : > { %p1022_p8 = pnand %p1021_p6, %p1017_p0 }
  0x2d   : > { %1025 = shalt.err (!%p1022_p8)
}
  0x2e   : > { %s1026_s26 = scalar_lea.vmem %s1248_s15, 256  ;;  %s1116_s29 = smov [#allocation4]  }
  0x2f   : > { %p1027_p9 = scmp.ne.s32.totalorder %s1248_s15, %s1026_s26  ;;  %s1031_s30 = sshll.u32 %s1116_s29, 4  ;;  %s1032_s30 = int_to_ptr.vmem [resolvable:$false] %s1031_s30 }
  0x30   : > { %s1033_s14 = scalar_lea.vmem %s1032_s30, 512  ;;  %p1034_p13 = scmp.lt.s32.totalorder %s1248_s15, %s1032_s30 }
  0x31   : > { %p1029_p10 = pnand %p1027_p9, %p1015_p12  ;;  %p1035_p1 = scmp.lt.s32.totalorder %s1033_s14, %s1026_s26 }
  0x33   : > { %p1030_p11 = pneg %p1029_p10  ;;  %p1036_p4 = por %p1035_p1, %p1034_p13 }
  0x35   : > { %p1037_p2 = pnand %p1036_p4, %p1030_p11 }
  0x37   : > { %1040 = shalt.err (!%p1037_p2)
}
  0x38   : > { %s1117_s19 = smov 128   ;;  %s1118_s20 = smov 8  }
  0x39   : > { %915 = dma.hbm_to_vmem [thread:$0]  (!%p1250_p7), %s1245_s9, 256, %s1248_s15, %s1254_s18, %s1117_s19, %s1117_s19, %s1118_s20  }
  0x3a   : > { %s1289_s23 = scalar_lea.hbm %s1394_s1, %s898_s28  ;;  %s303_s24 = scalar_lea.vmem [#allocation6], %s1237_s27 }
  0x3b   : > { %s310_s26 = sshll.u32 %s303_s24, 4  ;;  %s299_s29 = sand.u32 1, %s1111_s12   ;;  %s1292_s26 = int_to_ptr.vmem [resolvable:$true] %s310_s26 }
  0x3c   : > { %s300_s30 = scalar_lea.sflag [#allocation7], %s299_s29  ;;  %s1041_s14 = scalar_lea.hbm %s1289_s23, 256 }
  0x3d   : > { %p1042_p1 = scmp.ne.s32.totalorder %s1289_s23, %s1041_s14  ;;  %s1046_s28 = scalar_lea.hbm %s1394_s1, 512 }
  0x3e   : > { %p1047_p3 = scmp.lt.s32.totalorder %s1289_s23, %s1394_s1  ;;  %p1048_p6 = scmp.lt.s32.totalorder %s1046_s28, %s1041_s14 }
  0x3f   : > { %p1044_p4 = pnand %p1042_p1, %p1015_p12 }
  0x40   : > { %p1049_p8 = por %p1048_p6, %p1047_p3 }
  0x41   : > { %p1045_p0 = pneg %p1044_p4 }
  0x43   : > { %p1050_p9 = pnand %p1049_p8, %p1045_p0 }
  0x45   : > { %1053 = shalt.err (!%p1050_p9)
}
  0x46   : > { %s1054_s12 = scalar_lea.vmem %s1292_s26, 256  ;;  %s1119_s27 = smov [#allocation6]  }
  0x47   : > { %p1055_p10 = scmp.ne.s32.totalorder %s1292_s26, %s1054_s12  ;;  %s1059_s22 = sshll.u32 %s1119_s27, 4  ;;  %s1060_s22 = int_to_ptr.vmem [resolvable:$false] %s1059_s22 }
  0x48   : > { %s1061_s24 = scalar_lea.vmem %s1060_s22, 512  ;;  %p1062_p2 = scmp.lt.s32.totalorder %s1292_s26, %s1060_s22 }
  0x49   : > { %p1057_p11 = pnand %p1055_p10, %p1015_p12  ;;  %p1063_p1 = scmp.lt.s32.totalorder %s1061_s24, %s1054_s12 }
  0x4b   : > { %p1058_p13 = pneg %p1057_p11  ;;  %p1064_p4 = por %p1063_p1, %p1062_p2 }
  0x4d   : > { %p1065_p3 = pnand %p1064_p4, %p1058_p13 }
  0x4f   : > { %1068 = shalt.err (!%p1065_p3)
}
  0x50   : > { %918 = dma.hbm_to_vmem [thread:$0]  (!%p1250_p7), %s1289_s23, 256, %s1292_s26, %s300_s30, %s1117_s19, %s1117_s19, %s1118_s20  }
  0x51   : > { %322 = sbr.rel (%p1204_p5) target bundleno = 837 (0x345), region = 52  ;;  %s324_s29 = sand.u32 (!%p1204_p5), 1, %s1103_s10  }
  0x52   : > { %s1323_s14 = sshll.u32 (!%p1204_p5), %s324_s29, 4  ;;  %s325_s9 = scalar_lea.sflag (!%p1204_p5), [#allocation5], %s324_s29 }
  0x53   : > { %s328_s15 = scalar_lea.vmem (!%p1204_p5), [#allocation4], %s1323_s14  ;;  %p1408_p12 = scmp.ne.s32.totalorder (!%p1204_p5), %s1404_s7, 0 }
  0x56   : > { %1086 = dma.done.wait (%p1408_p12), %s325_s9, 256  }
  0x57   : > { %1088 = vsyncadd (%p1408_p12), %s325_s9, 4294967040  ;;  %s333_s16 = sand.u32 1, %s1192_s5   ;;  %s337_s13 = scalar_lea.vmem [#allocation6], %s1323_s14 }
  0x58   : > { %s334_s19 = scalar_lea.sflag [#allocation7], %s333_s16 }
  0x59   : > { %1090 = dma.done.wait (%p1408_p12), %s334_s19, 256  }
  0x5a   : > { %1092 = vsyncadd (%p1408_p12), %s334_s19, 4294967040  ;;  %p1409_p5 = scmp.eq.s32.totalorder %s1192_s5, 0 }
  0x5c   : > { %1094 = dma.done.wait (%p1409_p5), [#allocation7], 8192   ;;  %p1410_p7 = pmov %p1409_p5 }
  0x5d   : > { %v1120_v2 = vmov 0.0   ;;  %v453_v3 = vld [vmem:[#allocation8 + $0x1e8] sm:$0xff]  ;;  %v452_v4 = vld [vmem:[#allocation8 + $0x1e0] sm:$0xff]  ;;  %v455_v6 = vld [vmem:[#allocation8 + $0x1f8] sm:$0xff]  ;;  %vm689_vm0 = vcmask 7168   ;;  %vm764_vm1 = vcmask 1041409  }
  0x5e   : > { %1096 = vsyncadd (%p1410_p7), [#allocation7], 4294959104  ;;  %542 = vmatprep.mubr.f32.mxu0 %v1120_v2  ;;  %619 = vmatprep.mubr.f32.mxu1 %v1120_v2  ;;  %v449_v5 = vld [vmem:[#allocation8 + $0x1c8] sm:$0xff]  ;;  %v448_v7 = vld [vmem:[#allocation8 + $0x1c0] sm:$0xff]  ;;  %vm767_vm2 = vcmask 1041408   ;;  %p380_p0 = scmp.lt.s32.totalorder %s1192_s5, 1 }
  0x5f   : > { %478 = vmatprep.subr.mxu0 %v453_v3  ;;  %v454_v8 = vld [vmem:[#allocation8 + $0x1f0] sm:$0xff]  ;;  %555 = vmatprep.subr.mxu1 %v455_v6  ;;  %v445_v9 = vld [vmem:[#allocation8 + $0x1a8] sm:$0xff]  ;;  %v451_v10 = vld [vmem:[#allocation8 + $0x1d8] sm:$0xff]  ;;  %vm779_vm3 = vcmask 1024  }
  0x60   : > { %479 = vmatpush1.msra.mxu0 %v452_v4  ;;  %556 = vmatpush1.msra.mxu1 %v454_v8  ;;  %v444_v11 = vld [vmem:[#allocation8 + $0x1a0] sm:$0xff]  ;;  %v450_v12 = vld [vmem:[#allocation8 + $0x1d0] sm:$0xff]  ;;  %v447_v13 = vld [vmem:[#allocation8 + $0x1b8] sm:$0xff]  ;;  %s1416_s5 = smov (!%p380_p0, %s1192_s5), 1 }
  0x61   : > { %480 = vmatprep.subr.mxu0 %v449_v5  ;;  %557 = vmatprep.subr.mxu1 %v451_v10  ;;  %v441_v14 = vld [vmem:[#allocation8 + $0x188] sm:$0xff]  ;;  %v446_v15 = vld [vmem:[#allocation8 + $0x1b0] sm:$0xff]  ;;  %v440_v16 = vld [vmem:[#allocation8 + $0x180] sm:$0xff]  ;;  %s892_s18 = sshll.u32 %s1416_s5, 1 }
  0x62   : > { %481 = vmatpush1.msra.mxu0 %v448_v7  ;;  %558 = vmatpush1.msra.mxu1 %v450_v12  ;;  %v443_v17 = vld [vmem:[#allocation8 + $0x198] sm:$0xff]  ;;  %v437_v18 = vld [vmem:[#allocation8 + $0x168] sm:$0xff]  ;;  %v442_v19 = vld [vmem:[#allocation8 + $0x190] sm:$0xff]  ;;  %v458_v12 = vlaneseq  ;;  %s383_s27 = scalar_lea.vmem %s1400_s8, %s892_s18 }
  0x63   : > { %482 = vmatprep.subr.mxu0 %v445_v9  ;;  %559 = vmatprep.subr.mxu1 %v447_v13  ;;  %v436_v20 = vld [vmem:[#allocation8 + $0x160] sm:$0xff]  ;;  %v439_v21 = vld [vmem:[#allocation8 + $0x178] sm:$0xff]  ;;  %v433_v22 = vld [vmem:[#allocation8 + $0x148] sm:$0xff] }
  0x64   : > { %483 = vmatpush1.msra.mxu0 %v444_v11  ;;  %560 = vmatpush1.msra.mxu1 %v446_v15  ;;  %v438_v23 = vld [vmem:[#allocation8 + $0x170] sm:$0xff]  ;;  %v432_v24 = vld [vmem:[#allocation8 + $0x140] sm:$0xff]  ;;  %v435_v25 = vld [vmem:[#allocation8 + $0x158] sm:$0xff]  ;;  %v459_v13 = vshrl.u32 %v458_v12, 7 }
  0x65   : > { %484 = vmatprep.subr.mxu0 %v441_v14  ;;  %561 = vmatprep.subr.mxu1 %v443_v17  ;;  %v429_v26 = vld [vmem:[#allocation8 + $0x128] sm:$0xff]  ;;  %v434_v27 = vld [vmem:[#allocation8 + $0x150] sm:$0xff]  ;;  %v428_v28 = vld [vmem:[#allocation8 + $0x120] sm:$0xff] }
  0x66   : > { %485 = vmatpush1.msra.mxu0 %v440_v16  ;;  %562 = vmatpush1.msra.mxu1 %v442_v19  ;;  %v431_v29 = vld [vmem:[#allocation8 + $0x138] sm:$0xff]  ;;  %v425_v30 = vld [vmem:[#allocation8 + $0x108] sm:$0xff]  ;;  %v430_v31 = vld [vmem:[#allocation8 + $0x130] sm:$0xff]  ;;  %v460_v14 = vsub.s32 0, %v459_v13  ;;  %v468_v16 = vsub.s32 2, %v459_v13  ;;  %v464_v17 = vsub.s32 1, %v459_v13 }
  0x67   : > { %486 = vmatprep.subr.mxu0 %v437_v18  ;;  %563 = vmatprep.subr.mxu1 %v439_v21  ;;  %v424_v32 = vld [vmem:[#allocation8 + $0x100] sm:$0xff]  ;;  %v427_v33 = vld [vmem:[#allocation8 + $0x118] sm:$0xff]  ;;  %v421_v34 = vld [vmem:[#allocation8 + $0xe8] sm:$0xff] }
  0x68   : > { %487 = vmatpush1.msra.mxu0 %v436_v20  ;;  %564 = vmatpush1.msra.mxu1 %v438_v23  ;;  %v426_v35 = vld [vmem:[#allocation8 + $0x110] sm:$0xff]  ;;  %v420_v36 = vld [vmem:[#allocation8 + $0xe0] sm:$0xff]  ;;  %v423_v37 = vld [vmem:[#allocation8 + $0xf8] sm:$0xff] }
  0x69   : > { %488 = vmatprep.subr.mxu0 %v433_v22  ;;  %565 = vmatprep.subr.mxu1 %v435_v25  ;;  %v417_v38 = vld [vmem:[#allocation8 + $0xc8] sm:$0xff]  ;;  %v422_v39 = vld [vmem:[#allocation8 + $0xf0] sm:$0xff]  ;;  %v416_v40 = vld [vmem:[#allocation8 + $0xc0] sm:$0xff]  ;;  %v472_v25 = vsub.s32 3, %v459_v13 }
  0x6a   : > { %489 = vmatpush1.msra.mxu0 %v432_v24  ;;  %566 = vmatpush1.msra.mxu1 %v434_v27  ;;  %v419_v41 = vld [vmem:[#allocation8 + $0xd8] sm:$0xff]  ;;  %v413_v42 = vld [vmem:[#allocation8 + $0xa8] sm:$0xff]  ;;  %v418_v43 = vld [vmem:[#allocation8 + $0xd0] sm:$0xff] }
  0x6b   : > { %490 = vmatprep.subr.mxu0 %v429_v26  ;;  %567 = vmatprep.subr.mxu1 %v431_v29  ;;  %v412_v44 = vld [vmem:[#allocation8 + $0xa0] sm:$0xff]  ;;  %v415_v45 = vld [vmem:[#allocation8 + $0xb8] sm:$0xff]  ;;  %v409_v46 = vld [vmem:[#allocation8 + $0x88] sm:$0xff] }
  0x6c   : > { %491 = vmatpush1.msra.mxu0 %v428_v28  ;;  %568 = vmatpush1.msra.mxu1 %v430_v31  ;;  %v414_v47 = vld [vmem:[#allocation8 + $0xb0] sm:$0xff]  ;;  %v408_v48 = vld [vmem:[#allocation8 + $0x80] sm:$0xff]  ;;  %v405_v49 = vld [vmem:[#allocation8 + $0x68] sm:$0xff] }
  0x6d   : > { %492 = vmatprep.subr.mxu0 %v425_v30  ;;  %569 = vmatprep.subr.mxu1 %v427_v33  ;;  %v411_v50 = vld [vmem:[#allocation8 + $0x98] sm:$0xff]  ;;  %v410_v51 = vld [vmem:[#allocation8 + $0x90] sm:$0xff]  ;;  %v404_v54 = vld [vmem:[#allocation8 + $0x60] sm:$0xff] }
  0x6e   : > { %493 = vmatpush1.msra.mxu0 %v424_v32  ;;  %570 = vmatpush1.msra.mxu1 %v426_v35  ;;  %v384_v52 = vld [vmem:[%s328_s15] sm:$0xff]  ;;  %v407_v55 = vld [vmem:[#allocation8 + $0x78] sm:$0xff]  ;;  %v401_v56 = vld [vmem:[#allocation8 + $0x48] sm:$0xff] }
  0x6f   : > { %494 = vmatprep.subr.mxu0 %v421_v34  ;;  %571 = vmatprep.subr.mxu1 %v423_v37  ;;  %v386_v53 = vld [vmem:[%s337_s13] sm:$0xff]  ;;  %v397_v59 = vld [vmem:[#allocation8 + $0x28] sm:$0xff]  ;;  %v403_v60 = vld [vmem:[#allocation8 + $0x58] sm:$0xff] }
  0x70   : > { %495 = vmatpush1.msra.mxu0 %v420_v36  ;;  %572 = vmatpush1.msra.mxu1 %v422_v39  ;;  %v406_v57 = vld [vmem:[#allocation8 + $0x70] sm:$0xff]  ;;  %v400_v58 = vld [vmem:[#allocation8 + $0x40] sm:$0xff]  ;;  %v388_v61 = vadd.f32 %v386_v53, %v384_v52  ;;  %v385_v63 = vld [vmem:[%s328_s15 + $0x8] sm:$0xff] }
  0x71   : > { %496 = vmatprep.subr.mxu0 %v417_v38  ;;  %573 = vmatprep.subr.mxu1 %v419_v41  ;;  %v402_v62 = vld [vmem:[#allocation8 + $0x50] sm:$0xff]  ;;  %v387_v0 = vld [vmem:[%s337_s13 + $0x8] sm:$0xff]  ;;  %v396_v1 = vld [vmem:[#allocation8 + $0x20] sm:$0xff] }
  0x72   : > { %497 = vmatpush1.msra.mxu0 %v416_v40  ;;  %574 = vmatpush1.msra.mxu1 %v418_v43  ;;  %v399_v3 = vld [vmem:[#allocation8 + $0x38] sm:$0xff]  ;;  %v393_v4 = vld [vmem:[#allocation8 + $0x8] sm:$0xff]  ;;  %v398_v5 = vld [vmem:[#allocation8 + $0x30] sm:$0xff]  ;;  %v1350_v7 = vmul.f32 0.5, %v388_v61  ;;  %v389_v9 = vadd.f32 %v387_v0, %v385_v63 }
  0x73   : > { %498 = vmatprep.subr.mxu0 %v413_v42  ;;  %575 = vmatprep.subr.mxu1 %v415_v45  ;;  %v392_v6 = vld [vmem:[#allocation8] sm:$0xff]  ;;  %v395_v8 = vld [vmem:[#allocation8 + $0x18] sm:$0xff]  ;;  %v394_v10 = vld [vmem:[#allocation8 + $0x10] sm:$0xff] }
  0x74   : > { %499 = vmatpush1.msra.mxu0 %v412_v44  ;;  %576 = vmatpush1.msra.mxu1 %v414_v47  ;;  %v1353_v11 = vmul.f32 0.5, %v389_v9  ;;  %v456_v15 = vld [vmem:[%s1396_s3] sm:$0xf] }
  0x75   : > { %500 = vmatprep.subr.mxu0 %v409_v46  ;;  %577 = vmatprep.subr.mxu1 %v411_v50  ;;  %v461_v18 = vrot.slane %v456_v15, %v460_v14  ;;  %v469_v19 = vrot.slane %v456_v15, %v468_v16  ;;  %v465_v20 = vrot.slane %v456_v15, %v464_v17  ;;  %v640_v38 = vld [vmem:[%s1397_s4] sm:$0xf] }
  0x76   : > { %501 = vmatpush1.msra.mxu0 %v408_v48  ;;  %578 = vmatpush1.msra.mxu1 %v410_v51  ;;  %v473_v31 = vrot.slane %v456_v15, %v472_v25  ;;  %v649_v40 = vrot.slane %v640_v38, %v464_v17  ;;  %v645_v43 = vrot.slane %v640_v38, %v460_v14 }
  0x77   : > { %502 = vmatprep.subr.mxu0 %v405_v49  ;;  %579 = vmatprep.subr.mxu1 %v407_v55  ;;  %v653_v46 = vrot.slane %v640_v38, %v468_v16 }
  0x78   : > { %503 = vmatpush1.msra.mxu0 %v404_v54  ;;  %580 = vmatpush1.msra.mxu1 %v406_v57  ;;  %v657_v54 = vrot.slane %v640_v38, %v472_v25 }
  0x79   : > { %504 = vmatprep.subr.mxu0 %v401_v56  ;;  %581 = vmatprep.subr.mxu1 %v403_v60 }
  0x7a   : > { %505 = vmatpush1.msra.mxu0 %v400_v58  ;;  %582 = vmatpush1.msra.mxu1 %v402_v62 }
  0x7b   : > { %506 = vmatprep.subr.mxu0 %v397_v59  ;;  %583 = vmatprep.subr.mxu1 %v399_v3  ;;  %v893_v3 = vld [vmem:[#allocation2] ss:$0 sm:$0xff] }
  0x7c   : > { %507 = vmatpush1.msra.mxu0 %v396_v1  ;;  %584 = vmatpush1.msra.mxu1 %v398_v5  ;;  %v1121_v1 = vmov 0  }
  0x7d   : > { %508 = vmatprep.subr.mxu0 %v393_v4  ;;  %585 = vmatprep.subr.mxu1 %v395_v8 }
  0x7e   : > { %509 = vmatpush1.msra.mxu0 %v392_v6  ;;  %586 = vmatpush1.msra.mxu1 %v394_v10 }
  0x7f   : > { %543 = vmatmul.mubr.f32.vlgmr.msra.gmra.mxu0 %v1350_v7  ;;  %620 = vmatmul.mubr.f32.vlgmr.msra.gmra.mxu1 %v1350_v7 }
  0x80   : > { %548 = vmatprep.mubr.f32.mxu0 %v1120_v2  ;;  %625 = vmatprep.mubr.f32.mxu1 %v1120_v2 }
  0x81   : > { %961 = vset.pattern.permute.xlu1 %v1121_v1  ;;  %962 = vset.pattern.permute.xlu0 %v1121_v1 }
  0x83   : > { %549 = vmatmul.mubr.f32.gmra.mxu0 %v1353_v11  ;;  %626 = vmatmul.mubr.f32.gmra.mxu1 %v1353_v11 }
 0x13f   : > { %v544_v21 = vpop.f32.mrf.mxu0  ;;  %v621_v23 = vpop.f32.mrf.mxu1 }
 0x140   : > { %v545_v22 = vadd.f32 %v544_v21, %v461_v18  ;;  %v622_v24 = vadd.f32 %v621_v23, %v469_v19 }
 0x141   : > { %v546_v2 = vpop.f32.mrf.mxu0  ;;  %v623_v27 = vpop.f32.mrf.mxu1 }
 0x142   : > { %v547_v26 = vadd.f32 %v546_v2, %v465_v20  ;;  %963 = vtanh.f32 %v545_v22  ;;  %v624_v37 = vadd.f32 %v623_v27, %v473_v31 }
 0x143   : > { %v550_v28 = vpop.f32.mrf.mxu0  ;;  %v627_v30 = vpop.f32.mrf.mxu1 }
 0x144   : > { %965 = vtanh.f32 %v547_v26  ;;  %v551_v29 = vadd.f32 %v550_v28, %v461_v18  ;;  %v628_v33 = vadd.f32 %v627_v30, %v469_v19 }
 0x145   : > { %967 = vtanh.f32 %v622_v24  ;;  %v552_v32 = vpop.f32.mrf.mxu0  ;;  %v629_v35 = vpop.f32.mrf.mxu1 }
 0x146   : > { %969 = vtanh.f32 %v551_v29  ;;  %v553_v34 = vadd.f32 %v552_v32, %v465_v20  ;;  %v630_v36 = vadd.f32 %v629_v35, %v473_v31 }
 0x147   : > { %971 = vtanh.f32 %v628_v33 }
 0x148   : > { %973 = vtanh.f32 %v553_v34 }
 0x149   : > { %975 = vtanh.f32 %v630_v36 }
 0x14a   : > { %977 = vtanh.f32 %v624_v37 }
 0x14f   : > { %v964_v39 = vpop.eup %963 }
 0x150   : > { %v662_v52 = vmul.f32 %v964_v39, %v645_v43 }
 0x151   : > { %v966_v41 = vpop.eup %965 }
 0x152   : > { %v968_v42 = vpop.eup %967  ;;  %v663_v47 = vmul.f32 %v966_v41, %v649_v40 }
 0x153   : > { %v970_v44 = vpop.eup %969  ;;  %v664_v56 = vmul.f32 %v968_v42, %v653_v46 }
 0x154   : > { %v972_v45 = vpop.eup %971  ;;  %v666_v49 = vmul.f32 %v970_v44, %v645_v43  ;;  %v670_v57 = vadd.f32 %v663_v47, %v662_v52 }
 0x155   : > { %v974_v48 = vpop.eup %973  ;;  %v668_v51 = vmul.f32 %v972_v45, %v653_v46 }
 0x156   : > { %v667_v50 = vmul.f32 %v974_v48, %v649_v40  ;;  %v976_v53 = vpop.eup %975  ;;  %v671_v62 = vadd.f32 %v670_v57, %v664_v56 }
 0x157   : > { %v669_v58 = vmul.f32 %v976_v53, %v657_v54  ;;  %v978_v60 = vpop.eup %977 }
 0x158   : > { %v675_v55 = vadd.f32 %v667_v50, %v666_v49  ;;  %v665_v63 = vmul.f32 %v978_v60, %v657_v54 }
 0x15a   : > { %v676_v59 = vadd.f32 %v675_v55, %v668_v51  ;;  %v672_v0 = vadd.f32 %v671_v62, %v665_v63 }
 0x15c   : > { %v677_v61 = vadd.f32 %v676_v59, %v669_v58  ;;  %v894_v59 = vld [vmem:[%s1399_s6] ss:$0 sm:$0xff] }
 0x15e   : > { %678 = vadd.xlane.f32.xlu0 %v677_v61 }
 0x162   : > { %673 = vadd.xlane.f32.xlu0 %v672_v0 }
 0x1e7   : > { %v679_v4 = vpop.xlane.xlu0 %678 }
 0x1e8   : > { %v688_v5 = vadd.f32 %v893_v3, %v679_v4  ;;  %v895_v4 = vld [vmem:[#allocation3] ss:$0 sm:$0xff] }
 0x1ea   : > { %v697_v6 = vsel %vm689_vm0, %v688_v5, -inf }
 0x1eb   : > { %v698_v8 = vrot.slane %v697_v6, 4  ;;  %v674_v9 = vpop.xlane.xlu0 %673 }
 0x1ec   : > { %v687_v10 = vadd.f32 %v893_v3, %v674_v9 }
 0x1ed   : > { %v699_v12 = vmax.f32 %v697_v6, %v698_v8 }
 0x1ee   : > { %v690_v13 = vsel %vm689_vm0, %v687_v10, -inf }
 0x1ef   : > { %v700_v14 = vrot.slane %v699_v12, 2  ;;  %v691_v15 = vrot.slane %v690_v13, 4 }
 0x1f1   : > { %v701_v16 = vmax.f32 %v699_v12, %v700_v14  ;;  %v692_v17 = vmax.f32 %v690_v13, %v691_v15 }
 0x1f3   : > { %v702_v18 = vrot.slane %v701_v16, 1  ;;  %v693_v19 = vrot.slane %v692_v17, 2 }
 0x1f5   : > { %v703_v20 = vmax.f32 %v701_v16, %v702_v18  ;;  %v694_v21 = vmax.f32 %v692_v17, %v693_v19 }
 0x1f7   : > { %v705_v22 = vsub.f32 %v688_v5, %v703_v20  ;;  %v695_v23 = vrot.slane %v694_v21, 1 }
 0x1f9   : > { %v708_v2 = vmul.f32 1.442695, %v705_v22  ;;  %v696_v24 = vmax.f32 %v694_v21, %v695_v23 }
 0x1fb   : > { %979 = vpow2.f32 %v708_v2  ;;  %v704_v25 = vsub.f32 %v687_v10, %v696_v24 }
 0x1fd   : > { %v706_v26 = vmul.f32 1.442695, %v704_v25 }
 0x1ff   : > { %981 = vpow2.f32 %v706_v26 }
 0x208   : > { %v980_v27 = vpop.eup %979 }
 0x209   : > { %v717_v28 = vsel %vm689_vm0, %v980_v27, 0.0 }
 0x20a   : > { %v718_v29 = vrot.slane %v717_v28, 4 }
 0x20c   : > { %v982_v30 = vpop.eup %981  ;;  %v719_v31 = vadd.f32 %v718_v29, %v717_v28 }
 0x20d   : > { %v710_v32 = vsel %vm689_vm0, %v982_v30, 0.0 }
 0x20e   : > { %v720_v33 = vrot.slane %v719_v31, 2  ;;  %v711_v34 = vrot.slane %v710_v32, 4 }
 0x210   : > { %v721_v35 = vadd.f32 %v720_v33, %v719_v31  ;;  %v712_v36 = vadd.f32 %v711_v34, %v710_v32 }
 0x212   : > { %v722_v37 = vrot.slane %v721_v35, 1  ;;  %v713_v38 = vrot.slane %v712_v36, 2 }
 0x214   : > { %v723_v39 = vadd.f32 %v722_v37, %v721_v35  ;;  %v714_v40 = vadd.f32 %v713_v38, %v712_v36 }
 0x216   : > { %983 = vrcp.f32 %v723_v39  ;;  %v715_v41 = vrot.slane %v714_v40, 1 }
 0x218   : > { %v716_v42 = vadd.f32 %v715_v41, %v714_v40 }
 0x21a   : > { %985 = vrcp.f32 %v716_v42 }
 0x223   : > { %v984_v43 = vpop.eup %983 }
 0x224   : > { %v727_v44 = vmul.f32 %v984_v43, %v980_v27 }
 0x226   : > { %735 = vperm.xlu1 %961, %v727_v44  }
 0x227   : > { %v986_v45 = vpop.eup %985 }
 0x228   : > { %v725_v46 = vmul.f32 %v986_v45, %v982_v30 }
 0x22a   : > { %730 = vperm.xlu1 %961, %v725_v46  }
 0x2a1   : > { %v736_v47 = vpop.permute.xlu1 %735 }
 0x2a2   : > { %v739_v48 = vmul.f32 %v736_v47, %v1353_v11 }
 0x2a4   : > { %v746_v49 = vrot.slane %v739_v48, 4 }
 0x2a5   : > { %v731_v50 = vpop.permute.xlu1 %730 }
 0x2a6   : > { %v747_v51 = vadd.f32 %v746_v49, %v739_v48  ;;  %v738_v52 = vmul.f32 %v731_v50, %v1350_v7 }
 0x2a8   : > { %v748_v53 = vrot.slane %v747_v51, 2  ;;  %v740_v54 = vrot.slane %v738_v52, 4 }
 0x2aa   : > { %v749_v55 = vadd.f32 %v748_v53, %v747_v51  ;;  %v741_v56 = vadd.f32 %v740_v54, %v738_v52 }
 0x2ac   : > { %v750_v57 = vrot.slane %v749_v55, 1  ;;  %v742_v58 = vrot.slane %v741_v56, 2 }
 0x2ae   : > { %v751_v60 = vadd.f32 %v750_v57, %v749_v55  ;;  %v743_v61 = vadd.f32 %v742_v58, %v741_v56 }
 0x2b0   : > { %v744_v11 = vrot.slane %v743_v61, 1  ;;  %v760_v62 = vmul.f32 %v894_v59, %v751_v60 }
 0x2b2   : > { %v745_v63 = vadd.f32 %v744_v11, %v743_v61  ;;  %v763_v7 = vrot.slane %v760_v62, 7 }
 0x2b4   : > { %v759_v0 = vmul.f32 %v894_v59, %v745_v63 }
 0x2b6   : > { %v765_v1 = vsel %vm764_vm1, %v763_v7, %v759_v0 }
 0x2b7   : > { %v768_v3 = vsel %vm767_vm2, %v765_v1, 0.0 }
 0x2b8   : > { %769 = vadd.xlane.f32.xlu0 %v768_v3 }
 0x341   : > { %v770_v5 = vpop.xlane.xlu0 %769 }
 0x342   : > { %v778_v6 = vadd.f32 %v895_v4, %v770_v5 }
 0x344   : > { %780 = vst.msk [vmem:[%s383_s27] sm:$0x3] %vm779_vm3, %v778_v6 }
 0x345 PF: > { %p25_p6 = scmp.ge.s32.totalorder %s1217_s17, 4   ;;  %s1411_s9 = smov %s1103_s10 }
 0x346   : > { %s1412_s10 = smov %s1107_s11  ;;  %s1413_s11 = smov %s1234_s25 }
 0x347   : > { %s1414_s12 = smov %s1217_s17  ;;  %27 = sbr.rel (!%p25_p6) target bundleno = 8 (0x8), region = 109 }
 0x34c   :  { %800 = vsyncpa [#allocation5], 1 }
 0x34d   :  { %802 = vsyncpa [#allocation5 + $0x1], 1 }
 0x34e   :  { %803 = vsyncpa [#allocation7], 1 }
 0x34f   :  { %805 = vsyncpa [#allocation7 + $0x1], 1 }

</bundles_post_ra>
